<compile_context>
chip_gen: v7x
topology: tpu7x:2x2x1
jax: 0.10.0
libtpu: 0.0.40
codegen_flags: <defaults>
</compile_context>

<pallas_src>
import functools
import math

import jax
import jax.numpy as jnp
from jax.experimental import pallas as pl
from jax.experimental.pallas import tpu as pltpu


def _leaky_relu(x, alpha):
    return jnp.where(x > 0, x, alpha * x)


def _kernel(st_ref, d_ref, cs1_ref, cs2_ref, r_ref, t_ref, g_ref, o_ref, *, alpha):
    # st_ref: (Gb, N*F)   d_ref/o_ref: (Gb, N*N)
    # cs1/cs2: (N*F, N)   r_ref/t_ref: (N, N*N)   g_ref: (N*N, N)
    st = st_ref[...]
    s1 = jnp.dot(st, cs1_ref[...], preferred_element_type=jnp.float32)   # s1[g,i] = st[g,i,:].b1
    s2 = jnp.dot(st, cs2_ref[...], preferred_element_type=jnp.float32)   # s2[g,j] = st[g,j,:].b2

    R = r_ref[...]      # broadcast over j: (x @ R)[g, i*N+j] = x[g, i]
    T = t_ref[...]      # broadcast over i: (x @ T)[g, i*N+j] = x[g, j]
    e = _leaky_relu(
        jnp.dot(s1, R, preferred_element_type=jnp.float32)
        + jnp.dot(s2, T, preferred_element_type=jnp.float32), alpha)     # (Gb, N*N)

    # Exact per-row max: leakyrelu is monotone for alpha >= 0.
    row_max = _leaky_relu(s1 + jnp.max(s2, axis=-1, keepdims=True), alpha)        # (Gb, N)
    p = jnp.exp(e - jnp.dot(row_max, R, preferred_element_type=jnp.float32))      # (Gb, N*N)
    denom = jnp.dot(p, g_ref[...], preferred_element_type=jnp.float32)            # sum over j
    inv = pl.reciprocal(denom, approx=True)                                       # EUP slot
    attn = p * jnp.dot(inv, R, preferred_element_type=jnp.float32)                # (Gb, N*N)

    # TODO(synk): F.dropout omitted (eval mode -> identity).
    o_ref[...] = _leaky_relu(d_ref[...] * attn, alpha)


_GB_MAX = 2048   # batch elements per grid step -> ~14 MiB double-buffered VMEM; fits the
                 # 32 MiB scoped default with headroom on v5e/v6e/v7x (64 MiB physical on v7x).


def _round_up(x, m):
    return ((x + m - 1) // m) * m


def _choose_block_batch(G, gb_max=_GB_MAX):
    n_steps = max(1, -(-G // gb_max))
    if n_steps == 1 and G >= 16:
        n_steps = 2                        # >=2 "parallel" grid steps so v7x can use both TCs
    return _round_up(-(-G // n_steps), 8)  # sublane-aligned block height


def transferring_attention(demand, st_feat, W, a, alpha):
    *lead, N, F_ = st_feat.shape
    assert demand.shape == tuple(lead) + (N, N)
    assert W.shape == (F_, F_) and a.shape == (2 * F_, 1)
    assert alpha >= 0.0  # needed for the exact row-max identity used in the kernel
    NN, NF = N * N, N * F_
    G = 1
    for d in lead:
        G *= d

    f32 = jnp.float32
    # Lane-dense slabs. (HBM-bound kernel: st/dm could be fed as bf16 on v6e/v7x for ~2x less
    # traffic; kept f32 here so the strict f32 correctness check below stays meaningful.)
    st = st_feat.reshape(G, NF).astype(f32)
    dm = demand.reshape(G, NN).astype(f32)

    # Fold W into a (removes the (N,F)x(F,F) matmul entirely) and build the tiny constant
    # matrices that express the pairwise broadcast / group-sum structure as MXU matmuls.
    Wf = W.astype(f32)
    af = a.astype(f32)[:, 0]
    b1, b2 = Wf @ af[:F_], Wf @ af[F_:]
    eye = jnp.eye(N, dtype=f32)
    cs1 = jnp.kron(eye, b1[:, None])               # (N*F, N): cs1[i*F+f, i] = b1[f]
    cs2 = jnp.kron(eye, b2[:, None])               # (N*F, N)
    R = jnp.kron(eye, jnp.ones((1, N), f32))       # (N, N*N): R[i, i*N+j] = 1
    T = jnp.kron(jnp.ones((1, N), f32), eye)       # (N, N*N): T[j, i*N+j] = 1
    Gm = R.T                                       # (N*N, N): group-sum over j

    gb = _choose_block_batch(G)
    G_pad = _round_up(G, gb)
    if G_pad != G:                                  # zero padding is NaN-safe here
        st = jnp.pad(st, ((0, G_pad - G), (0, 0)))
        dm = jnp.pad(dm, ((0, G_pad - G), (0, 0)))

    kernel = functools.partial(_kernel, alpha=float(alpha))
    out = pl.pallas_call(
        kernel,
        out_shape=jax.ShapeDtypeStruct((G_pad, NN), f32),
        grid=(G_pad // gb,),
        in_specs=[
            pl.BlockSpec((gb, NF), lambda g: (g, 0)),    # st_feat slab
            pl.BlockSpec((gb, NN), lambda g: (g, 0)),    # demand slab
            pl.BlockSpec((NF, N), lambda g: (0, 0)),     # cs1 (resident)
            pl.BlockSpec((NF, N), lambda g: (0, 0)),     # cs2 (resident)
            pl.BlockSpec((N, NN), lambda g: (0, 0)),     # R   (resident)
            pl.BlockSpec((N, NN), lambda g: (0, 0)),     # T   (resident)
            pl.BlockSpec((NN, N), lambda g: (0, 0)),     # Gm  (resident)
        ],
        out_specs=pl.BlockSpec((gb, NN), lambda g: (g, 0)),
        compiler_params=pltpu.CompilerParams(dimension_semantics=("parallel",)),
    )(st, dm, cs1, cs2, R, T, Gm)
    return out[:G].reshape(*lead, N, N)


def _reference(demand, st_feat, W, a, alpha):
    """Plain-JAX replica of the PyTorch forward (eval mode)."""
    F_ = W.shape[0]
    with jax.default_matmul_precision("highest"):
        h = st_feat @ W
        s1 = h @ a[:F_, 0]
        s2 = h @ a[F_:, 0]
    e = _leaky_relu(s1[..., :, None] + s2[..., None, :], alpha)
    attn = jax.nn.softmax(e, axis=-1)
    return _leaky_relu(demand * attn, alpha)


def _xavier_uniform(key, shape, gain):
    fan_out, fan_in = shape[0], shape[1]
    limit = gain * math.sqrt(6.0 / (fan_in + fan_out))
    return jax.random.uniform(key, shape, jnp.float32, -limit, limit)


if __name__ == "__main__":
    nhid = 8            # -> F = 4*nhid = 32, ad = 2*F = 64
    ngrid = 8           # N
    alpha = 0.2
    N, F_ = ngrid, 4 * nhid

    key = jax.random.PRNGKey(0)
    kW, ka, kst, kd = jax.random.split(key, 4)

    # Deterministic parameter init (mirrors nn.init.xavier_uniform_ with gain=1.414).
    W = _xavier_uniform(kW, (F_, F_), 1.414)
    a = _xavier_uniform(ka, (2 * F_, 1), 1.414)

    lead = (2, 2, 5)    # G = 20 -> exercises a 2-step grid and the batch-padding path
    st_feat = jax.random.normal(kst, lead + (N, F_), jnp.float32)
    demand = jax.random.normal(kd, lead + (N, N), jnp.float32)

    out = jax.block_until_ready(transferring_attention(demand, st_feat, W, a, alpha))
    ref = _reference(demand, st_feat, W, a, alpha)

    assert out.shape == ref.shape, (out.shape, ref.shape)
    max_err = float(jnp.max(jnp.abs(out - ref)))
    # Tolerance leaves room for the EUP approximate reciprocal in the softmax normalization.
    assert jnp.allclose(out, ref, rtol=5e-3, atol=5e-4), max_err

    print("KERNEL_OK")
</pallas_src>

<mosaic_0001>
module attributes {stable_mosaic.version = 11 : i64} {
  func.func @_kernel(%arg0: i32, %arg1: memref<16x256xf32, #tpu.memory_space<vmem>>, %arg2: memref<16x64xf32, #tpu.memory_space<vmem>>, %arg3: memref<256x8xf32, #tpu.memory_space<vmem>>, %arg4: memref<256x8xf32, #tpu.memory_space<vmem>>, %arg5: memref<8x64xf32, #tpu.memory_space<vmem>>, %arg6: memref<8x64xf32, #tpu.memory_space<vmem>>, %arg7: memref<64x8xf32, #tpu.memory_space<vmem>>, %arg8: memref<16x64xf32, #tpu.memory_space<vmem>>) attributes {dimension_semantics = [#tpu.dimension_semantics<parallel>], iteration_bounds = array<i64: 2>, scalar_prefetch = 0 : i64, scratch_operands = 0 : i64, tpu.core_type = #tpu.core_type<tc>, window_params = [{transform_indices = @transform_0, window_bounds = array<i64: 16, 256>}, {transform_indices = @transform_1, window_bounds = array<i64: 16, 64>}, {pipeline_mode = #tpu.pipeline_mode<synchronous>, transform_indices = @transform_2, window_bounds = array<i64: 256, 8>}, {pipeline_mode = #tpu.pipeline_mode<synchronous>, transform_indices = @transform_3, window_bounds = array<i64: 256, 8>}, {pipeline_mode = #tpu.pipeline_mode<synchronous>, transform_indices = @transform_4, window_bounds = array<i64: 8, 64>}, {pipeline_mode = #tpu.pipeline_mode<synchronous>, transform_indices = @transform_5, window_bounds = array<i64: 8, 64>}, {pipeline_mode = #tpu.pipeline_mode<synchronous>, transform_indices = @transform_6, window_bounds = array<i64: 64, 8>}, {transform_indices = @transform_7, window_bounds = array<i64: 16, 64>}]} {
    %c0 = arith.constant 0 : index
    %c0_0 = arith.constant 0 : index
    %0 = vector.load %arg1[%c0, %c0_0] : memref<16x256xf32, #tpu.memory_space<vmem>>, vector<16x256xf32>
    %c0_1 = arith.constant 0 : index
    %c0_2 = arith.constant 0 : index
    %1 = vector.load %arg3[%c0_1, %c0_2] : memref<256x8xf32, #tpu.memory_space<vmem>>, vector<256x8xf32>
    %cst = arith.constant dense<0.000000e+00> : vector<16x8xf32>
    %2 = tpu.matmul %0, %1, %cst {dimension_numbers = #tpu.dot_dimension_numbers<[1], [0], [0], [1], [0, 0, 1, 1], [], []>} : vector<16x256xf32>, vector<256x8xf32>, vector<16x8xf32> -> vector<16x8xf32>
    %c0_3 = arith.constant 0 : index
    %c0_4 = arith.constant 0 : index
    %3 = vector.load %arg4[%c0_3, %c0_4] : memref<256x8xf32, #tpu.memory_space<vmem>>, vector<256x8xf32>
    %cst_5 = arith.constant dense<0.000000e+00> : vector<16x8xf32>
    %4 = tpu.matmul %0, %3, %cst_5 {dimension_numbers = #tpu.dot_dimension_numbers<[1], [0], [0], [1], [0, 0, 1, 1], [], []>} : vector<16x256xf32>, vector<256x8xf32>, vector<16x8xf32> -> vector<16x8xf32>
    %c0_6 = arith.constant 0 : index
    %c0_7 = arith.constant 0 : index
    %5 = vector.load %arg5[%c0_6, %c0_7] : memref<8x64xf32, #tpu.memory_space<vmem>>, vector<8x64xf32>
    %c0_8 = arith.constant 0 : index
    %c0_9 = arith.constant 0 : index
    %6 = vector.load %arg6[%c0_8, %c0_9] : memref<8x64xf32, #tpu.memory_space<vmem>>, vector<8x64xf32>
    %cst_10 = arith.constant dense<0.000000e+00> : vector<16x64xf32>
    %7 = tpu.matmul %2, %5, %cst_10 {dimension_numbers = #tpu.dot_dimension_numbers<[1], [0], [0], [1], [0, 0, 1, 1], [], []>} : vector<16x8xf32>, vector<8x64xf32>, vector<16x64xf32> -> vector<16x64xf32>
    %cst_11 = arith.constant dense<0.000000e+00> : vector<16x64xf32>
    %8 = tpu.matmul %4, %6, %cst_11 {dimension_numbers = #tpu.dot_dimension_numbers<[1], [0], [0], [1], [0, 0, 1, 1], [], []>} : vector<16x8xf32>, vector<8x64xf32>, vector<16x64xf32> -> vector<16x64xf32>
    %9 = arith.addf %7, %8 : vector<16x64xf32>
    %cst_12 = arith.constant 0.000000e+00 : f32
    %10 = vector.broadcast %cst_12 : f32 to vector<16x64xf32>
    %11 = arith.cmpf ogt, %9, %10 : vector<16x64xf32>
    %cst_13 = arith.constant 2.000000e-01 : f32
    %12 = vector.broadcast %cst_13 : f32 to vector<16x64xf32>
    %13 = arith.mulf %12, %9 : vector<16x64xf32>
    %14 = arith.select %11, %9, %13 : vector<16x64xi1>, vector<16x64xf32>
    %cst_14 = arith.constant dense<0xFF800000> : vector<16xf32>
    %15 = vector.multi_reduction <maximumf>, %4, %cst_14 [1] : vector<16x8xf32> to vector<16xf32>
    %16 = vector.shape_cast %15 : vector<16xf32> to vector<16x1xf32>
    %17 = vector.broadcast %16 : vector<16x1xf32> to vector<16x8xf32>
    %18 = arith.addf %2, %17 : vector<16x8xf32>
    %cst_15 = arith.constant 0.000000e+00 : f32
    %19 = vector.broadcast %cst_15 : f32 to vector<16x8xf32>
    %20 = arith.cmpf ogt, %18, %19 : vector<16x8xf32>
    %cst_16 = arith.constant 2.000000e-01 : f32
    %21 = vector.broadcast %cst_16 : f32 to vector<16x8xf32>
    %22 = arith.mulf %21, %18 : vector<16x8xf32>
    %23 = arith.select %20, %18, %22 : vector<16x8xi1>, vector<16x8xf32>
    %cst_17 = arith.constant dense<0.000000e+00> : vector<16x64xf32>
    %24 = tpu.matmul %23, %5, %cst_17 {dimension_numbers = #tpu.dot_dimension_numbers<[1], [0], [0], [1], [0, 0, 1, 1], [], []>} : vector<16x8xf32>, vector<8x64xf32>, vector<16x64xf32> -> vector<16x64xf32>
    %25 = arith.subf %14, %24 : vector<16x64xf32>
    %26 = math.exp %25 : vector<16x64xf32>
    %c0_18 = arith.constant 0 : index
    %c0_19 = arith.constant 0 : index
    %27 = vector.load %arg7[%c0_18, %c0_19] : memref<64x8xf32, #tpu.memory_space<vmem>>, vector<64x8xf32>
    %cst_20 = arith.constant dense<0.000000e+00> : vector<16x8xf32>
    %28 = tpu.matmul %26, %27, %cst_20 {dimension_numbers = #tpu.dot_dimension_numbers<[1], [0], [0], [1], [0, 0, 1, 1], [], []>} : vector<16x64xf32>, vector<64x8xf32>, vector<16x8xf32> -> vector<16x8xf32>
    %29 = tpu.reciprocal %28 {approx = true} : vector<16x8xf32> -> vector<16x8xf32>
    %cst_21 = arith.constant dense<0.000000e+00> : vector<16x64xf32>
    %30 = tpu.matmul %29, %5, %cst_21 {dimension_numbers = #tpu.dot_dimension_numbers<[1], [0], [0], [1], [0, 0, 1, 1], [], []>} : vector<16x8xf32>, vector<8x64xf32>, vector<16x64xf32> -> vector<16x64xf32>
    %31 = arith.mulf %26, %30 : vector<16x64xf32>
    %c0_22 = arith.constant 0 : index
    %c0_23 = arith.constant 0 : index
    %32 = vector.load %arg2[%c0_22, %c0_23] : memref<16x64xf32, #tpu.memory_space<vmem>>, vector<16x64xf32>
    %33 = arith.mulf %32, %31 : vector<16x64xf32>
    %cst_24 = arith.constant 0.000000e+00 : f32
    %34 = vector.broadcast %cst_24 : f32 to vector<16x64xf32>
    %35 = arith.cmpf ogt, %33, %34 : vector<16x64xf32>
    %cst_25 = arith.constant 2.000000e-01 : f32
    %36 = vector.broadcast %cst_25 : f32 to vector<16x64xf32>
    %37 = arith.mulf %36, %33 : vector<16x64xf32>
    %38 = arith.select %35, %33, %37 : vector<16x64xi1>, vector<16x64xf32>
    %c0_26 = arith.constant 0 : index
    %c0_27 = arith.constant 0 : index
    %39 = vector.load %arg8[%c0_26, %c0_27] : memref<16x64xf32, #tpu.memory_space<vmem>>, vector<16x64xf32>
    tpu.vector_store %arg8[%c0_26, %c0_27], %38 {strides = array<i32>} : memref<16x64xf32, #tpu.memory_space<vmem>>, vector<16x64xf32>,
    return
  }
  func.func @transform_0(%arg0: i32) -> (i32, i32) {
    %c0_i32 = arith.constant 0 : i32
    %c0_i32_0 = arith.constant 0 : i32
    return %arg0, %c0_i32 : i32, i32
  }
  func.func @transform_1(%arg0: i32) -> (i32, i32) {
    %c0_i32 = arith.constant 0 : i32
    %c0_i32_0 = arith.constant 0 : i32
    return %arg0, %c0_i32 : i32, i32
  }
  func.func @transform_2(%arg0: i32) -> (i32, i32) {
    %c0_i32 = arith.constant 0 : i32
    %c0_i32_0 = arith.constant 0 : i32
    %c0_i32_1 = arith.constant 0 : i32
    return %c0_i32, %c0_i32_0 : i32, i32
  }
  func.func @transform_3(%arg0: i32) -> (i32, i32) {
    %c0_i32 = arith.constant 0 : i32
    %c0_i32_0 = arith.constant 0 : i32
    %c0_i32_1 = arith.constant 0 : i32
    return %c0_i32, %c0_i32_0 : i32, i32
  }
  func.func @transform_4(%arg0: i32) -> (i32, i32) {
    %c0_i32 = arith.constant 0 : i32
    %c0_i32_0 = arith.constant 0 : i32
    %c0_i32_1 = arith.constant 0 : i32
    return %c0_i32, %c0_i32_0 : i32, i32
  }
  func.func @transform_5(%arg0: i32) -> (i32, i32) {
    %c0_i32 = arith.constant 0 : i32
    %c0_i32_0 = arith.constant 0 : i32
    %c0_i32_1 = arith.constant 0 : i32
    return %c0_i32, %c0_i32_0 : i32, i32
  }
  func.func @transform_6(%arg0: i32) -> (i32, i32) {
    %c0_i32 = arith.constant 0 : i32
    %c0_i32_0 = arith.constant 0 : i32
    %c0_i32_1 = arith.constant 0 : i32
    return %c0_i32, %c0_i32_0 : i32, i32
  }
  func.func @transform_7(%arg0: i32) -> (i32, i32) {
    %c0_i32 = arith.constant 0 : i32
    %c0_i32_0 = arith.constant 0 : i32
    return %arg0, %c0_i32 : i32, i32
  }
}

</mosaic_0001>

<bundles_post_ra>
// kernel: tpu_custom_call.1
= control target key start
LH: loop header
LB: loop body
LE: loop exit
PB: predicated region body
PF: predicated region fallthrough
CT: control target
= control target key end

     0   :  { %12 = vsyncpa [#allocation3], 0  ;;  %s1833_s0 = inlined_call_operand.vmem [shape: f32[32,256], index: 0, kind: input, shape index: {}]   ;;  %s1834_s1 = inlined_call_operand.vmem [shape: f32[32,64], index: 1, kind: input, shape index: {}]   ;;  %s1835_s2 = inlined_call_operand.vmem [shape: f32[256,8], index: 2, kind: input, shape index: {}]   ;;  %s1836_s3 = inlined_call_operand.vmem [shape: f32[256,8], index: 3, kind: input, shape index: {}]   ;;  %s1837_s4 = inlined_call_operand.vmem [shape: f32[8,64], index: 4, kind: input, shape index: {}]   ;;  %s1838_s5 = inlined_call_operand.vmem [shape: f32[8,64], index: 5, kind: input, shape index: {}]   ;;  %s1839_s6 = inlined_call_operand.vmem [shape: f32[64,8], index: 6, kind: input, shape index: {}]   ;;  %s1840_s7 = inlined_call_operand.hbm [shape: f32[32,64], index: 7, kind: output, shape index: {}]  }
   0x1   :  { %14 = vsyncpa [#allocation3 + $0x1], 0  ;;  %s1472_s24 = smov 0   ;;  %s1474_s25 = smov 0  }
   0x2   :  { %s1476_s26 = smov 0   ;;  %s1478_s27 = smov 0  }
   0x3 LB: > { %s1493_s28 = sadd.s32 4294967295, %s1427_s27   ;;  %s1070_s29 = sadd.s32 4294967294, %s1427_s27   ;;  %s1427_s27 = sphi %s1478_s27, %s1847_s27   ;;  %s1423_s26 = sphi %s1476_s26, %s1846_s26   ;;  %s1419_s25 = sphi %s1474_s25, %s1845_s25   ;;  %s1415_s24 = sphi %s1472_s24, %s1844_s24  }
   0x4   : > { %s1497_s30 = sadd.s32 1, %s1427_s27   ;;  %s184_s8 = sadd.s32 1, %s1423_s26 }
   0x5   : > { %s181_s9 = ssub.s32 %s1427_s27, %s1497_s30  ;;  %p194_p0 = scmp.ne.s32.totalorder %s1423_s26, %s1419_s25 }
   0x6   : > { %p182_p1 = scmp.eq.s32.totalorder %s181_s9, 0  ;;  %p195_p2 = scmp.eq.s32.totalorder %s1493_s28, 1 }
   0x7   : > { %p200_p3 = scmp.ne.s32.totalorder %s1419_s25, %s1415_s24  ;;  %p201_p4 = scmp.eq.s32.totalorder %s1070_s29, 1 }
   0x8   : > { %s1508_s10 = scalar_select %p182_p1, %s1423_s26, %s184_s8  }
   0x9   : > { %p1510_p5 = por %p195_p2, %p194_p0  ;;  %p1514_p6 = por %p201_p4, %p200_p3 }
   0xa   : > { %p1073_p7 = scmp.ge.s32.totalorder %s1427_s27, 1  ;;  %p253_p8 = scmp.lt.s32.totalorder %s1427_s27, 3 }
   0xc   : > { %p254_p9 = pnand %p1073_p7, %p253_p8 }
   0xd   : > { %v432_v0 = vld [vmem:[%s1836_s3 + $0x80] sm:$0xff] (!%p254_p9)  ;;  %v433_v1 = vld [vmem:[%s1836_s3 + $0x88] sm:$0xff] (!%p254_p9)  ;;  %v434_v5 = vld [vmem:[%s1836_s3 + $0x90] sm:$0xff] (!%p254_p9)  ;;  %s1075_s8 = sshll.u32 (!%p254_p9), %s1493_s28, 1  ;;  %vm525_vm0 = vcmask (!%p254_p9), 64512   ;;  %vm803_vm5 = vcmask (!%p254_p9), 523264  }
   0xe   : > { %257 = sbr.rel (%p254_p9) target bundleno = 1104 (0x450), region = 48  ;;  %v416_v2 = vld [vmem:[%s1836_s3] sm:$0xff] (!%p254_p9)  ;;  %v1266_v3 = vpack.c.bf16 (!%p254_p9), %v433_v1, %v432_v0  ;;  %v417_v4 = vld [vmem:[%s1836_s3 + $0x8] sm:$0xff] (!%p254_p9)  ;;  %v435_v6 = vld [vmem:[%s1836_s3 + $0x98] sm:$0xff] (!%p254_p9)  ;;  %p1568_p10 = scmp.lt.s32.totalorder (!%p254_p9), %s1075_s8, 3 }
   0xf   : > { %v1268_v7 = vpack.c.bf16 (!%p254_p9), %v417_v4, %v416_v2  ;;  %v1270_v8 = vpack.c.bf16 (!%p254_p9), %v435_v6, %v434_v5  ;;  %v418_v9 = vld [vmem:[%s1836_s3 + $0x10] sm:$0xff] (!%p254_p9)  ;;  %v419_v10 = vld [vmem:[%s1836_s3 + $0x18] sm:$0xff] (!%p254_p9)  ;;  %v325_v11 = vld [vmem:[%s1835_s2 + $0x80] sm:$0xff] (!%p254_p9)  ;;  %s1096_s22 = sshll.u32 (!%p254_p9), %s1493_s28, 8  ;;  %s1429_s14 = smov (!%p254_p9), [#allocation2]  }
  0x10   : > { %1267 = vmatprep.subr.bf16.mxu1 (!%p254_p9), %v1266_v3  ;;  %v326_v12 = vld [vmem:[%s1835_s2 + $0x88] sm:$0xff] (!%p254_p9)  ;;  %v436_v13 = vld [vmem:[%s1836_s3 + $0xa0] sm:$0xff] (!%p254_p9)  ;;  %v1272_v15 = vpack.c.bf16 (!%p254_p9), %v419_v10, %v418_v9  ;;  %v327_v23 = vld [vmem:[%s1835_s2 + $0x90] sm:$0xff] (!%p254_p9) }
  0x11   : > { %v437_v14 = vld [vmem:[%s1836_s3 + $0xa8] sm:$0xff] (!%p254_p9)  ;;  %1269 = vmatpush3.bf16.msra.mxu1 (!%p254_p9), %v1268_v7  ;;  %v1234_v16 = vpack.c.bf16 (!%p254_p9), %v326_v12, %v325_v11  ;;  %v309_v17 = vld [vmem:[%s1835_s2] sm:$0xff] (!%p254_p9)  ;;  %v328_v24 = vld [vmem:[%s1835_s2 + $0x98] sm:$0xff] (!%p254_p9) }
  0x12   : > { %v310_v18 = vld [vmem:[%s1835_s2 + $0x8] sm:$0xff] (!%p254_p9)  ;;  %v420_v19 = vld [vmem:[%s1836_s3 + $0x20] sm:$0xff] (!%p254_p9)  ;;  %1271 = vmatprep.subr.bf16.mxu1 (!%p254_p9), %v1270_v8  ;;  %v1274_v20 = vpack.c.bf16 (!%p254_p9), %v437_v14, %v436_v13  ;;  %v1238_v25 = vpack.c.bf16 (!%p254_p9), %v328_v24, %v327_v23  ;;  %v438_v26 = vld [vmem:[%s1836_s3 + $0xb0] sm:$0xff] (!%p254_p9) }
  0x13   : > { %v1236_v21 = vpack.c.bf16 (!%p254_p9), %v310_v18, %v309_v17  ;;  %v421_v22 = vld [vmem:[%s1836_s3 + $0x28] sm:$0xff] (!%p254_p9)  ;;  %1235 = vmatprep.subr.bf16.mxu0 (!%p254_p9), %v1234_v16  ;;  %v439_v27 = vld [vmem:[%s1836_s3 + $0xb8] sm:$0xff] (!%p254_p9)  ;;  %v311_v28 = vld [vmem:[%s1835_s2 + $0x10] sm:$0xff] (!%p254_p9) }
  0x14   : > { %v312_v29 = vld [vmem:[%s1835_s2 + $0x18] sm:$0xff] (!%p254_p9)  ;;  %v1276_v30 = vpack.c.bf16 (!%p254_p9), %v421_v22, %v420_v19  ;;  %v422_v32 = vld [vmem:[%s1836_s3 + $0x30] sm:$0xff] (!%p254_p9)  ;;  %v329_v33 = vld [vmem:[%s1835_s2 + $0xa0] sm:$0xff] (!%p254_p9)  ;;  %v1278_v35 = vpack.c.bf16 (!%p254_p9), %v439_v27, %v438_v26 }
  0x15   : > { %1237 = vmatpush3.bf16.msra.mxu0 %v1236_v21  ;;  %1273 = vmatpush3.bf16.msra.mxu1 %v1272_v15  ;;  %v1240_v31 = vpack.c.bf16 %v312_v29, %v311_v28  ;;  %v330_v34 = vld [vmem:[%s1835_s2 + $0xa8] sm:$0xff]  ;;  %s1849_s8 = smov (!%p1568_p10, %s1075_s8), 3  ;;  %v423_v36 = vld [vmem:[%s1836_s3 + $0x38] sm:$0xff]  ;;  %v313_v38 = vld [vmem:[%s1835_s2 + $0x20] sm:$0xff] }
  0x16   : > { %1239 = vmatprep.subr.bf16.mxu0 %v1238_v25  ;;  %1275 = vmatprep.subr.bf16.mxu1 %v1274_v20  ;;  %v1242_v37 = vpack.c.bf16 %v330_v34, %v329_v33  ;;  %v314_v39 = vld [vmem:[%s1835_s2 + $0x28] sm:$0xff]  ;;  %v440_v40 = vld [vmem:[%s1836_s3 + $0xc0] sm:$0xff]  ;;  %v331_v42 = vld [vmem:[%s1835_s2 + $0xb0] sm:$0xff]  ;;  %v1280_v45 = vpack.c.bf16 %v423_v36, %v422_v32  ;;  %s1095_s17 = sshll.u32 %s1849_s8, 4  ;;  %s1079_s15 = sshll.u32 %s1849_s8, 3 }
  0x17   : > { %v441_v41 = vld [vmem:[%s1836_s3 + $0xc8] sm:$0xff]  ;;  %v1244_v43 = vpack.c.bf16 %v314_v39, %v313_v38  ;;  %v332_v44 = vld [vmem:[%s1835_s2 + $0xb8] sm:$0xff]  ;;  %v424_v46 = vld [vmem:[%s1836_s3 + $0x40] sm:$0xff]  ;;  %s1657_s21 = scalar_lea.vmem %s1833_s0, %s1095_s17  ;;  %s288_s17 = sand.u32 1, %s1419_s25  }
  0x18   : > { %v1246_v47 = vpack.c.bf16 %v332_v44, %v331_v42  ;;  %v315_v48 = vld [vmem:[%s1835_s2 + $0x30] sm:$0xff]  ;;  %v316_v49 = vld [vmem:[%s1835_s2 + $0x38] sm:$0xff]  ;;  %v1282_v50 = vpack.c.bf16 %v441_v41, %v440_v40  ;;  %v425_v51 = vld [vmem:[%s1836_s3 + $0x48] sm:$0xff]  ;;  %s1074_s16 = sshll.u32 %s288_s17, 4  ;;  %s302_s20 = scalar_lea.vmem %s1834_s1, %s1079_s15 }
  0x19   : > { %1241 = vmatpush3.bf16.msra.mxu0 %v1240_v31  ;;  %1277 = vmatpush3.bf16.msra.mxu1 %v1276_v30  ;;  %v333_v52 = vld [vmem:[%s1835_s2 + $0xc0] sm:$0xff]  ;;  %v334_v53 = vld [vmem:[%s1835_s2 + $0xc8] sm:$0xff]  ;;  %v442_v54 = vld [vmem:[%s1836_s3 + $0xd0] sm:$0xff]  ;;  %v1248_v56 = vpack.c.bf16 %v316_v49, %v315_v48  ;;  %v1284_v57 = vpack.c.bf16 %v425_v51, %v424_v46  ;;  %s290_s23 = scalar_lea.vmem [#allocation2], %s1074_s16  ;;  %s1792_s28 = scalar_lea.sflag [#allocation3], %s288_s17 }
  0x1a   : > { %1243 = vmatprep.subr.bf16.mxu0 %v1242_v37  ;;  %1279 = vmatprep.subr.bf16.mxu1 %v1278_v35  ;;  %v443_v55 = vld [vmem:[%s1836_s3 + $0xd8] sm:$0xff]  ;;  %v426_v58 = vld [vmem:[%s1836_s3 + $0x50] sm:$0xff]  ;;  %v1250_v59 = vpack.c.bf16 %v334_v53, %v333_v52  ;;  %v317_v60 = vld [vmem:[%s1835_s2 + $0x40] sm:$0xff]  ;;  %s996_s29 = sshll.u32 %s290_s23, 4  ;;  %s1369_s15 = sshll.u32 %s1429_s14, 4  ;;  %s1788_s29 = int_to_ptr.vmem [resolvable:$true] %s996_s29  ;;  %s1370_s15 = int_to_ptr.vmem [resolvable:$false] %s1369_s15 }
  0x1b   : > { %v318_v61 = vld [vmem:[%s1835_s2 + $0x48] sm:$0xff]  ;;  %v1286_v62 = vpack.c.bf16 %v443_v55, %v442_v54  ;;  %v427_v63 = vld [vmem:[%s1836_s3 + $0x58] sm:$0xff]  ;;  %v335_v0 = vld [vmem:[%s1835_s2 + $0xd0] sm:$0xff]  ;;  %s1365_s13 = scalar_lea.vmem %s1788_s29, 256  ;;  %s1371_s16 = scalar_lea.vmem %s1370_s15, 512 }
  0x1c   : > { %v336_v1 = vld [vmem:[%s1835_s2 + $0xd8] sm:$0xff]  ;;  %v444_v2 = vld [vmem:[%s1836_s3 + $0xe0] sm:$0xff]  ;;  %v445_v3 = vld [vmem:[%s1836_s3 + $0xe8] sm:$0xff]  ;;  %v1252_v5 = vpack.c.bf16 %v318_v61, %v317_v60  ;;  %v1288_v6 = vpack.c.bf16 %v427_v63, %v426_v58  ;;  %p1366_p11 = scmp.ne.s32.totalorder %s1788_s29, %s1365_s13  ;;  %p1372_p0 = scmp.lt.s32.totalorder %s1788_s29, %s1370_s15 }
  0x1d   : > { %1245 = vmatpush3.bf16.msra.mxu0 %v1244_v43  ;;  %1281 = vmatpush3.bf16.msra.mxu1 %v1280_v45  ;;  %v306_v4 = vld [vmem:[%s1657_s21 + $0x8] sm:$0xff]  ;;  %v428_v7 = vld [vmem:[%s1836_s3 + $0x60] sm:$0xff]  ;;  %v1254_v8 = vpack.c.bf16 %v336_v1, %v335_v0  ;;  %v319_v9 = vld [vmem:[%s1835_s2 + $0x50] sm:$0xff]  ;;  %v1290_v11 = vpack.c.bf16 %v445_v3, %v444_v2  ;;  %p1373_p1 = scmp.lt.s32.totalorder %s1371_s16, %s1365_s13 }
  0x1e   : > { %1247 = vmatprep.subr.bf16.mxu0 %v1246_v47  ;;  %1283 = vmatprep.subr.bf16.mxu1 %v1282_v50  ;;  %v320_v10 = vld [vmem:[%s1835_s2 + $0x58] sm:$0xff]  ;;  %v429_v12 = vld [vmem:[%s1836_s3 + $0x68] sm:$0xff]  ;;  %v337_v13 = vld [vmem:[%s1835_s2 + $0xe0] sm:$0xff]  ;;  %p1367_p12 = pnand %p1366_p11, %p1510_p5 }
  0x1f   : > { %512 = vmatprep.mubr.f32.mxu1 %v306_v4  ;;  %v338_v14 = vld [vmem:[%s1835_s2 + $0xe8] sm:$0xff]  ;;  %405 = vmatprep.mubr.f32.mxu0 %v306_v4  ;;  %v446_v15 = vld [vmem:[%s1836_s3 + $0xf0] sm:$0xff]  ;;  %v447_v16 = vld [vmem:[%s1836_s3 + $0xf8] sm:$0xff]  ;;  %v1256_v17 = vpack.c.bf16 %v320_v10, %v319_v9  ;;  %v1292_v18 = vpack.c.bf16 %v429_v12, %v428_v7  ;;  %p1374_p2 = por %p1373_p1, %p1372_p0 }
  0x20   : > { %v430_v19 = vld [vmem:[%s1836_s3 + $0x70] sm:$0xff]  ;;  %v1258_v20 = vpack.c.bf16 %v338_v14, %v337_v13  ;;  %v321_v21 = vld [vmem:[%s1835_s2 + $0x60] sm:$0xff]  ;;  %v322_v22 = vld [vmem:[%s1835_s2 + $0x68] sm:$0xff]  ;;  %v1294_v23 = vpack.c.bf16 %v447_v16, %v446_v15  ;;  %p1368_p13 = pneg %p1367_p12 }
  0x21   : > { %1249 = vmatpush3.bf16.msra.mxu0 %v1248_v56  ;;  %1285 = vmatpush3.bf16.msra.mxu1 %v1284_v57  ;;  %v431_v24 = vld [vmem:[%s1836_s3 + $0x78] sm:$0xff]  ;;  %v339_v25 = vld [vmem:[%s1835_s2 + $0xf0] sm:$0xff]  ;;  %v1260_v27 = vpack.c.bf16 %v322_v22, %v321_v21  ;;  %v305_v33 = vld [vmem:[%s1657_s21] sm:$0xff] }
  0x22   : > { %1251 = vmatprep.subr.bf16.mxu0 %v1250_v59  ;;  %1287 = vmatprep.subr.bf16.mxu1 %v1286_v62  ;;  %v340_v26 = vld [vmem:[%s1835_s2 + $0xf8] sm:$0xff]  ;;  %v1296_v28 = vpack.c.bf16 %v431_v24, %v430_v19  ;;  %v323_v30 = vld [vmem:[%s1835_s2 + $0x70] sm:$0xff]  ;;  %v524_v36 = vld [vmem:[%s1838_s5] sm:$0xff]  ;;  %p1375_p3 = pnand %p1374_p2, %p1368_p13 }
  0x23   : > { %v1262_v29 = vpack.c.bf16 %v340_v26, %v339_v25  ;;  %v324_v31 = vld [vmem:[%s1835_s2 + $0x78] sm:$0xff]  ;;  %v307_v35 = vld [vmem:[%s1657_s21 + $0x10] sm:$0xff]  ;;  %v523_v37 = vld [vmem:[%s1837_s4] sm:$0xff] }
  0x24   : > { %v1264_v32 = vpack.c.bf16 %v324_v31, %v323_v30  ;;  %v308_v34 = vld [vmem:[%s1657_s21 + $0x18] sm:$0xff]  ;;  %v795_v62 = vld [vmem:[%s1839_s6] sm:$0xff]  ;;  %v796_v63 = vld [vmem:[%s1839_s6 + $0x8] sm:$0xff]  ;;  %s1786_s21 = scalar_lea.hbm %s1840_s7, %s1096_s22 }
  0x25   : > { %1253 = vmatpush3.bf16.msra.mxu0 %v1252_v5  ;;  %1289 = vmatpush3.bf16.msra.mxu1 %v1288_v6  ;;  %v1298_v0 = vpack.c.bf16 %v796_v63, %v795_v62  ;;  %v797_v1 = vld [vmem:[%s1839_s6 + $0x10] sm:$0xff]  ;;  %v798_v2 = vld [vmem:[%s1839_s6 + $0x18] sm:$0xff]  ;;  %v799_v4 = vld [vmem:[%s1839_s6 + $0x20] sm:$0xff] }
  0x26   : > { %1255 = vmatprep.subr.bf16.mxu0 %v1254_v8  ;;  %1291 = vmatprep.subr.bf16.mxu1 %v1290_v11  ;;  %v1302_v3 = vpack.c.bf16 %v798_v2, %v797_v1  ;;  %v800_v5 = vld [vmem:[%s1839_s6 + $0x28] sm:$0xff]  ;;  %v801_v6 = vld [vmem:[%s1839_s6 + $0x30] sm:$0xff]  ;;  %v802_v8 = vld [vmem:[%s1839_s6 + $0x38] sm:$0xff] }
  0x27   : > { %v1306_v7 = vpack.c.bf16 %v800_v5, %v799_v4  ;;  %v1310_v9 = vpack.c.bf16 %v802_v8, %v801_v6  ;;  %v970_v30 = vld [vmem:[%s302_s20] sm:$0xff] }
  0x29   : > { %1257 = vmatpush3.bf16.msra.mxu0 %v1256_v17  ;;  %1293 = vmatpush3.bf16.msra.mxu1 %v1292_v18 }
  0x2a   : > { %1259 = vmatprep.subr.bf16.mxu0 %v1258_v20  ;;  %1295 = vmatprep.subr.bf16.mxu1 %v1294_v23 }
  0x2d   : > { %1261 = vmatpush3.bf16.msra.mxu0 %v1260_v27  ;;  %1297 = vmatpush3.bf16.msra.mxu1 %v1296_v28  ;;  %v971_v27 = vld [vmem:[%s302_s20 + $0x8] sm:$0xff] }
  0x2e   : > { %1263 = vmatprep.subr.bf16.mxu0 %v1262_v29  ;;  %1299 = vmatprep.subr.bf16.mxu1 %v1298_v0 }
  0x30   : > { %513 = vmatmul.mubr.f32.vlgmr.msra.gmra.mrb[0].mxu1 %v305_v33 }
  0x31   : > { %1265 = vmatpush3.bf16.msra.mxu0 %v1264_v32  ;;  %517 = vmatprep.mubr.f32.mxu1 %v308_v34 }
  0x32   : > { %1195 = vmatprep.subr.mxu0 %v524_v36  ;;  %1301 = vmatpush3.bf16.msra.mxu1 %v1298_v0 }
  0x33   : > { %1303 = vmatprep.subr.bf16.mxu1 %v1302_v3 }
  0x34   : > { %406 = vmatmul.mubr.f32.vlgmr.msra.gmra.mrb[0].mxu0 %v305_v33  ;;  %518 = vmatmul.mubr.f32.gmra.mrb[2].mxu1 %v307_v35 }
  0x35   : > { %410 = vmatprep.mubr.f32.mxu0 %v308_v34  ;;  %1196 = vmatpush3.msra.mxu0 %v524_v36 }
  0x36   : > { %1200 = vmatprep.subr.mxu0 %v523_v37  ;;  %1305 = vmatpush3.bf16.msra.mxu1 %v1302_v3 }
  0x37   : > { %1307 = vmatprep.subr.bf16.mxu1 %v1306_v7 }
  0x38   : > { %411 = vmatmul.mubr.f32.gmra.mrb[2].mxu0 %v307_v35 }
  0x3a   : > { %1309 = vmatpush3.bf16.msra.mxu1 %v1306_v7 }
  0x3b   : > { %1311 = vmatprep.subr.bf16.mxu1 %v1310_v9 }
  0x3e   : > { %1313 = vmatpush3.bf16.msra.mxu1 %v1310_v9 }
 0x103   : > { %v1167_v38 = vpop.f32.mrb[0].mxu1 }
 0x104   : > { %v1168_v39 = vpop.f32.mrb[1].mxu1 }
 0x105   : > { %v1169_v40 = vadd.f32 %v1168_v39, %v1167_v38 }
 0x107   : > { %v1129_v41 = vpop.f32.mrb[0].mxu0  ;;  %v1170_v42 = vpop.f32.mrb[2].mxu1  ;;  %1197 = vmatprep.mubr.msk.f32.mxu0 %vm525_vm0, %v1169_v40  ;;  %v694_v43 = vsel %vm525_vm0, %v1169_v40, -inf }
 0x108   : > { %v1130_v44 = vpop.f32.mrb[1].mxu0  ;;  %v1171_v45 = vpop.f32.mrb[3].mxu1  ;;  %695 = vmax.xlane.f32.xlu0 %v694_v43 }
 0x109   : > { %v1131_v46 = vadd.f32 %v1130_v44, %v1129_v41  ;;  %v1172_v47 = vadd.f32 %v1171_v45, %v1170_v42 }
 0x10b   : > { %v1132_v48 = vpop.f32.mrb[2].mxu0  ;;  %1198 = vmatmul.mubr.msk.f32.vlgmr.msra.gmra.mrb[4].mxu0 %vm525_vm0, %v1172_v47  ;;  %v697_v49 = vsel %vm525_vm0, %v1172_v47, -inf }
 0x10c   : > { %v1133_v50 = vpop.f32.mrb[3].mxu0  ;;  %698 = vmax.xlane.f32.xlu0 %v697_v49  ;;  %1201 = vmatpush3.msra.mxu0 %v523_v37 }
 0x10d   : > { %v1134_v51 = vadd.f32 %v1133_v50, %v1132_v48  ;;  %1202 = vmatprep.mubr.msk.f32.mxu0 %vm525_vm0, %v1131_v46  ;;  %1205 = vmatprep.subr.mxu0 %v523_v37 }
 0x113   : > { %1203 = vmatmul.mubr.msk.f32.vlgmr.msra.gmra.mrb[4].mxu0 %vm525_vm0, %v1134_v51 }
 0x114   : > { %1206 = vmatpush3.msra.mxu0 %v523_v37 }
 0x115   : > { %1229 = vmatprep.subr.mxu0 %v523_v37 }
 0x195   : > { %v696_v52 = vpop.xlane.xlu0 %695 }
 0x196   : > { %v700_v53 = vadd.f32 %v1131_v46, %v696_v52 }
 0x198   : > { %vm702_vm1 = vcmp.gt.f32.partialorder %v700_v53, 0.0  ;;  %v704_v54 = vmul.f32 0.2, %v700_v53 }
 0x199   : > { %v699_v55 = vpop.xlane.xlu0 %698 }
 0x19a   : > { %v701_v56 = vadd.f32 %v1134_v51, %v699_v55  ;;  %v706_v57 = vsel %vm702_vm1, %v700_v53, %v704_v54 }
 0x19b   : > { %1207 = vmatprep.mubr.msk.f32.mxu0 %vm525_vm0, %v706_v57 }
 0x19c   : > { %vm703_vm2 = vcmp.gt.f32.partialorder %v701_v56, 0.0  ;;  %v705_v58 = vmul.f32 0.2, %v701_v56 }
 0x19e   : > { %v707_v59 = vsel %vm703_vm2, %v701_v56, %v705_v58 }
 0x19f   : > { %1208 = vmatmul.mubr.msk.f32.vlgmr.msra.gmra.mrb[6].mxu0 %vm525_vm0, %v707_v59 }
 0x1a0   : > { %1230 = vmatpush3.msra.mxu0 %v523_v37 }
 0x1e6   : > { %v1204_v60 = vpop.f32.mrb[4].mxu0 }
 0x1e7   : > { %v679_v61 = vpop.f32.mrb[5].mxu0  ;;  %v691_v10 = vmul.f32 0.2, %v1204_v60  ;;  %vm689_vm3 = vcmp.gt.f32.partialorder %v1204_v60, 0.0 }
 0x1e8   : > { %v690_v11 = vmul.f32 0.2, %v679_v61  ;;  %vm688_vm4 = vcmp.gt.f32.partialorder %v679_v61, 0.0 }
 0x1e9   : > { %v693_v12 = vsel %vm689_vm3, %v1204_v60, %v691_v10 }
 0x1ea   : > { %v692_v15 = vsel %vm688_vm4, %v679_v61, %v690_v11 }
 0x272   : > { %v1209_v13 = vpop.f32.mrb[6].mxu0 }
 0x273   : > { %v790_v14 = vsub.f32 %v693_v12, %v1209_v13  ;;  %v780_v16 = vpop.f32.mrb[7].mxu0 }
 0x274   : > { %v789_v17 = vsub.f32 %v692_v15, %v780_v16 }
 0x275   : > { %v793_v18 = vmul.f32 1.442695, %v790_v14 }
 0x276   : > { %v791_v19 = vmul.f32 1.442695, %v789_v17 }
 0x278   : > { %1357 = vpow2.f32 %v791_v19 }
 0x279   : > { %1359 = vpow2.f32 %v793_v18 }
 0x282   : > { %v1358_v20 = vpop.eup %1357 }
 0x283   : > { %v1360_v21 = vpop.eup %1359  ;;  %1226 = vmatprep.mubr.msk.f32.mxu1 %vm803_vm5, %v1358_v20 }
 0x284   : > { %1227 = vmatmul.mubr.msk.f32.vlgmr.msra.gmra.mrb[4].mxu1 %vm803_vm5, %v1360_v21 }
 0x357   : > { %v1228_v22 = vpop.f32.mrb[4].mxu1 }
 0x358   : > { %v876_v23 = vpop.f32.mrb[5].mxu1 }
 0x359   : > { %1361 = vrcp.f32 %v876_v23 }
 0x35a   : > { %1363 = vrcp.f32 %v1228_v22 }
 0x363   : > { %v1362_v24 = vpop.eup %1361 }
 0x364   : > { %v1364_v25 = vpop.eup %1363  ;;  %1231 = vmatprep.mubr.msk.f32.mxu0 %vm525_vm0, %v1362_v24 }
 0x365   : > { %1232 = vmatmul.mubr.msk.f32.vlgmr.msra.gmra.mrb[8].mxu0 %vm525_vm0, %v1364_v25 }
 0x438   : > { %v1233_v26 = vpop.f32.mrb[8].mxu0 }
 0x439   : > { %v969_v28 = vmul.f32 %v1360_v21, %v1233_v26  ;;  %v959_v29 = vpop.f32.mrb[9].mxu0 }
 0x43a   : > { %v968_v31 = vmul.f32 %v1358_v20, %v959_v29 }
 0x43b   : > { %v973_v32 = vmul.f32 %v971_v27, %v969_v28 }
 0x43c   : > { %v972_v33 = vmul.f32 %v970_v30, %v968_v31 }
 0x43d   : > { %vm975_vm6 = vcmp.gt.f32.partialorder %v973_v32, 0.0  ;;  %v977_v34 = vmul.f32 0.2, %v973_v32 }
 0x43e   : > { %vm974_vm7 = vcmp.gt.f32.partialorder %v972_v33, 0.0  ;;  %v976_v35 = vmul.f32 0.2, %v972_v33 }
 0x43f   : > { %v979_v36 = vsel %vm975_vm6, %v973_v32, %v977_v34 }
 0x440   : > { %981 = vst.msk [vmem:[%s290_s23 + $0x8] sm:$0xff] %vm803_vm5, %v979_v36  ;;  %v978_v37 = vsel %vm974_vm7, %v972_v33, %v976_v35 }
 0x441   : > { %980 = vst.msk [vmem:[%s290_s23] sm:$0xff] %vm803_vm5, %v978_v37 }
 0x442   : > { %1378 = shalt.err (!%p1375_p3)
}
 0x443   : > { %s1379_s17 = scalar_lea.hbm %s1786_s21, 256  ;;  %s1383_s20 = scalar_lea.hbm %s1840_s7, 512 }
 0x444   : > { %p1380_p4 = scmp.ne.s32.totalorder %s1786_s21, %s1379_s17  ;;  %p1384_p9 = scmp.lt.u32.totalorder %s1786_s21, %s1840_s7 }
 0x445   : > { %p1385_p10 = scmp.lt.u32.totalorder %s1383_s20, %s1379_s17  ;;  %p1387_p12 = scmp.lt.u32.totalorder %s1379_s17, %s1786_s21 }
 0x446   : > { %p1381_p7 = pnand %p1380_p4, %p1510_p5 }
 0x447   : > { %p1386_p11 = por %p1385_p10, %p1384_p9 }
 0x448   : > { %p1382_p8 = pneg %p1381_p7 }
 0x449   : > { %p1388_p13 = por %p1387_p12, %p1386_p11 }
 0x44b   : > { %p1389_p0 = pnand %p1388_p13, %p1382_p8 }
 0x44d   : > { %1392 = shalt.err (!%p1389_p0)
}
 0x44e   : > { %s1430_s8 = smov 128   ;;  %s1431_s9 = smov 8  }
 0x44f   : > { %1316 = dma.vmem_to_hbm [thread:$0]  (%p1510_p5), %s1788_s29, 256, %s1786_s21, %s1792_s28, %s1430_s8, %s1430_s8, %s1431_s9  }
 0x450 PF: > { %p1322_p1 = scmp.ge.s32.totalorder %s1427_s27, 2  ;;  %s1011_s13 = sand.u32 1, %s1415_s24  }
 0x451   : > { %s1012_s14 = scalar_lea.sflag [#allocation3], %s1011_s13 }
 0x452   : > { %p1319_p2 = pnand %p1322_p1, %p1514_p6 }
 0x454   : > { %1410 = dma.done.wait (!%p1319_p2), %s1012_s14, 256  }
 0x455   : > { %1412 = vsyncadd (!%p1319_p2), %s1012_s14, 4294967040  ;;  %p17_p3 = scmp.ge.s32.totalorder %s1497_s30, 4   ;;  %s1844_s24 = smov %s1419_s25 }
 0x456   : > { %s1845_s25 = smov %s1423_s26  ;;  %s1846_s26 = smov %s1508_s10 }
 0x457   : > { %s1847_s27 = smov %s1497_s30  ;;  %19 = sbr.rel (!%p17_p3) target bundleno = 3 (0x3), region = 86 }
 0x45e   :  { %1017 = vsyncpa [#allocation3], 1 }
 0x45f   :  { %1019 = vsyncpa [#allocation3 + $0x1], 1 }

</bundles_post_ra>
